<compile_context>
chip_gen: v6e
topology: v6e:2x2x1
jax: 0.10.0
libtpu: 0.0.40
codegen_flags: <defaults>
</compile_context>

<pallas_src>
import functools

import jax
import jax.numpy as jnp
from jax import lax
from jax.experimental import pallas as pl
from jax.experimental.pallas import tpu as pltpu

NUM_UNITS = 10
IN_FEATURES = 20
OUT_FEATURES = 2


def _round_up(n, m):
    return ((n + m - 1) // m) * m


def mlp_kernel(x_ref, w0_ref, b0_ref, w1_ref, b1_ref, w2_ref, b2_ref, o_ref):
    # x tile arrives batch-major straight from HBM: (blk, IN_FEATURES) f32.
    # Cast to bf16 for native single-pass MXU matmuls (weights are already bf16).
    xb = x_ref[...].astype(jnp.bfloat16)                      # (blk, 20) bf16

    # dense0 + ReLU, contracting the feature axes of both operands
    # (W0^T[10,20] . X^T -> lane-dense (10, blk); batch stays on the lane axis).
    dn = (((1,), (1,)), ((), ()))
    h0 = lax.dot_general(w0_ref[...], xb, dimension_numbers=dn,
                         preferred_element_type=jnp.float32)   # (10, blk) f32
    h0 = jnp.maximum(h0 + b0_ref[...], 0.0)                    # bias/ReLU in f32 (v5e-safe)

    # TODO(synk): Dropout(0.5) is identity in eval/inference mode; training-mode
    # stochastic masking (pltpu.prng_seed + pltpu.stateful_bernoulli) not emitted.

    # dense1 + ReLU : (10,10) @ (10, blk) -> (10, blk), lane-dense.
    h1 = jnp.dot(w1_ref[...], h0.astype(jnp.bfloat16),
                 preferred_element_type=jnp.float32)
    h1 = jnp.maximum(h1 + b1_ref[...], 0.0)

    # output layer : (2,10) @ (10, blk) -> (2, blk), lane-dense stores.
    out = jnp.dot(w2_ref[...], h1.astype(jnp.bfloat16),
                  preferred_element_type=jnp.float32)
    o_ref[...] = (out + b2_ref[...]).astype(o_ref.dtype)


@functools.partial(jax.jit, static_argnames=("block_b", "min_pallas_batch"))
def my_module_forward(x, w0, b0, w1, b1, w2, b2, *,
                      block_b=16384, min_pallas_batch=4096):
    """MyModule forward. x: (batch, 20) f32 -> (batch, 2) f32.

    Weights are stored (in_features, out_features) and biases (1, out_features),
    matching the plain-JAX reference `relu(x @ W + b)`.  Only the tiny weights
    get relaid out / cast in the wrapper; X is consumed in place.
    """
    batch = x.shape[0]

    # Small-batch fast path: fused XLA GEMM chain beats any custom kernel here.
    if batch < min_pallas_batch:
        h = jnp.maximum(x @ w0 + b0, 0.0)
        h = jnp.maximum(h @ w1 + b1, 0.0)
        return h @ w2 + b2

    # Lane tile: multiple of 128, capped at ~half the (128-rounded) batch so the
    # batch grid has >= 2 parallel steps (v7x megacore), and by block_b.
    b128 = _round_up(batch, 128)
    blk = min(block_b, max(128, _round_up((b128 + 1) // 2, 128)))
    steps = pl.cdiv(batch, blk)
    padded = steps * blk          # output allocation only; X itself is NOT padded

    # Torch-style (out, in) bf16 weights and (out, 1) f32 bias columns.
    w0t = w0.T.astype(jnp.bfloat16)
    w1t = w1.T.astype(jnp.bfloat16)
    w2t = w2.T.astype(jnp.bfloat16)
    b0c, b1c, b2c = b0.T, b1.T, b2.T

    # Constant index_map -> weight/bias tiles stay VMEM-resident across the grid.
    const = lambda a: pl.BlockSpec(a.shape, lambda i: (0, 0))

    # VMEM budget: the (blk, 20) f32 input block is lane-padded to 128 in VMEM
    # (blk*512 B per buffer, double-buffered) plus lane-dense activations/output.
    vmem_limit = max(32 << 20, min(int(blk) * 2048 + (8 << 20), 96 << 20))

    out_t = pl.pallas_call(
        mlp_kernel,
        out_shape=jax.ShapeDtypeStruct((OUT_FEATURES, padded), jnp.float32),
        grid=(steps,),
        in_specs=[
            pl.BlockSpec((blk, IN_FEATURES), lambda i: (i, 0)),   # X tile, streamed as-is
            const(w0t), const(b0c),
            const(w1t), const(b1c),
            const(w2t), const(b2c),
        ],
        out_specs=pl.BlockSpec((OUT_FEATURES, blk), lambda i: (0, i)),
        compiler_params=pltpu.CompilerParams(
            dimension_semantics=("parallel",),                    # shard batch across TCs
            vmem_limit_bytes=vmem_limit),
    )(x, w0t, b0c, w1t, b1c, w2t, b2c)

    # Tiny (2, padded) -> (batch, 2) relayout; ~8 B/row, negligible vs the X read.
    return out_t[:, :batch].T


def init_params(key):
    # Deterministic init mimicking torch.nn.Linear's U(-1/sqrt(fan_in), 1/sqrt(fan_in)).
    k = jax.random.split(key, 6)

    def linear(kw, kb, fan_in, fan_out):
        bound = 1.0 / jnp.sqrt(fan_in)
        w = jax.random.uniform(kw, (fan_in, fan_out), jnp.float32, -bound, bound)
        b = jax.random.uniform(kb, (1, fan_out), jnp.float32, -bound, bound)
        return w, b

    w0, b0 = linear(k[0], k[1], IN_FEATURES, NUM_UNITS)
    w1, b1 = linear(k[2], k[3], NUM_UNITS, NUM_UNITS)
    w2, b2 = linear(k[4], k[5], NUM_UNITS, OUT_FEATURES)
    return w0, b0, w1, b1, w2, b2


if __name__ == "__main__":
    key = jax.random.PRNGKey(0)
    kx, kp = jax.random.split(key)

    params = init_params(kp)
    w0, b0, w1, b1, w2, b2 = params

    def reference(x, mirror_bf16):
        # mirror_bf16=True mirrors the kernel's bf16 MXU inputs / f32 epilogue.
        if mirror_bf16:
            xr = x.astype(jnp.bfloat16)
            W0, W1, W2 = (w0.astype(jnp.bfloat16), w1.astype(jnp.bfloat16),
                          w2.astype(jnp.bfloat16))
            cd = jnp.bfloat16
        else:
            xr, W0, W1, W2, cd = x, w0, w1, w2, jnp.float32
        h = jnp.maximum(jnp.dot(xr, W0, preferred_element_type=jnp.float32) + b0, 0.0)
        h = jnp.maximum(jnp.dot(h.astype(cd), W1, preferred_element_type=jnp.float32) + b1, 0.0)
        return jnp.dot(h.astype(cd), W2, preferred_element_type=jnp.float32) + b2

    # Pallas path: 2-step grid with a ragged final block (no padding of X).
    x1 = jax.random.normal(kx, (300, IN_FEATURES), jnp.float32)
    out1 = my_module_forward(x1, *params, min_pallas_batch=0)
    jax.block_until_ready(out1)
    assert out1.shape == (300, OUT_FEATURES)
    assert jnp.allclose(out1, reference(x1, True), atol=2e-2, rtol=2e-2)

    # Pallas path: many grid steps with a small forced tile (resident weights).
    x2 = jax.random.normal(kx, (1024, IN_FEATURES), jnp.float32)
    out2 = my_module_forward(x2, *params, block_b=128, min_pallas_batch=0)
    jax.block_until_ready(out2)
    assert out2.shape == (1024, OUT_FEATURES)
    assert jnp.allclose(out2, reference(x2, True), atol=2e-2, rtol=2e-2)

    # Small-batch fast path (pure XLA, f32).
    x3 = jax.random.normal(kx, (8, IN_FEATURES), jnp.float32)
    out3 = my_module_forward(x3, *params)
    jax.block_until_ready(out3)
    assert out3.shape == (8, OUT_FEATURES)
    assert jnp.allclose(out3, reference(x3, False), atol=1e-4, rtol=1e-4)

    print("KERNEL_OK")
</pallas_src>

<mosaic_0001>
module attributes {stable_mosaic.version = 11 : i64} {
  func.func @mlp_kernel(%arg0: i32, %arg1: memref<256x20xf32, #tpu.memory_space<vmem>>, %arg2: memref<10x20xbf16, #tpu.memory_space<vmem>>, %arg3: memref<10x1xf32, #tpu.memory_space<vmem>>, %arg4: memref<10x10xbf16, #tpu.memory_space<vmem>>, %arg5: memref<10x1xf32, #tpu.memory_space<vmem>>, %arg6: memref<2x10xbf16, #tpu.memory_space<vmem>>, %arg7: memref<2x1xf32, #tpu.memory_space<vmem>>, %arg8: memref<2x256xf32, #tpu.memory_space<vmem>>) attributes {dimension_semantics = [#tpu.dimension_semantics<parallel>], iteration_bounds = array<i64: 2>, scalar_prefetch = 0 : i64, scratch_operands = 0 : i64, tpu.core_type = #tpu.core_type<tc>, window_params = [{transform_indices = @transform_0, window_bounds = array<i64: 256, 20>}, {pipeline_mode = #tpu.pipeline_mode<synchronous>, transform_indices = @transform_1, window_bounds = array<i64: 10, 20>}, {pipeline_mode = #tpu.pipeline_mode<synchronous>, transform_indices = @transform_2, window_bounds = array<i64: 10, 1>}, {pipeline_mode = #tpu.pipeline_mode<synchronous>, transform_indices = @transform_3, window_bounds = array<i64: 10, 10>}, {pipeline_mode = #tpu.pipeline_mode<synchronous>, transform_indices = @transform_4, window_bounds = array<i64: 10, 1>}, {pipeline_mode = #tpu.pipeline_mode<synchronous>, transform_indices = @transform_5, window_bounds = array<i64: 2, 10>}, {pipeline_mode = #tpu.pipeline_mode<synchronous>, transform_indices = @transform_6, window_bounds = array<i64: 2, 1>}, {transform_indices = @transform_7, window_bounds = array<i64: 2, 256>}]} {
    %c0 = arith.constant 0 : index
    %c0_0 = arith.constant 0 : index
    %0 = vector.load %arg1[%c0, %c0_0] : memref<256x20xf32, #tpu.memory_space<vmem>>, vector<256x20xf32>
    %1 = arith.truncf %0 : vector<256x20xf32> to vector<256x20xbf16>
    %c0_1 = arith.constant 0 : index
    %c0_2 = arith.constant 0 : index
    %2 = vector.load %arg2[%c0_1, %c0_2] : memref<10x20xbf16, #tpu.memory_space<vmem>>, vector<10x20xbf16>
    %cst = arith.constant dense<0.000000e+00> : vector<10x256xf32>
    %3 = tpu.matmul %2, %1, %cst {dimension_numbers = #tpu.dot_dimension_numbers<[1], [1], [0], [0], [0, 0, 1, 0], [], []>} : vector<10x20xbf16>, vector<256x20xbf16>, vector<10x256xf32> -> vector<10x256xf32>
    %c0_3 = arith.constant 0 : index
    %c0_4 = arith.constant 0 : index
    %4 = vector.load %arg3[%c0_3, %c0_4] : memref<10x1xf32, #tpu.memory_space<vmem>>, vector<10x1xf32>
    %5 = vector.broadcast %4 : vector<10x1xf32> to vector<10x256xf32>
    %6 = arith.addf %3, %5 : vector<10x256xf32>
    %cst_5 = arith.constant 0.000000e+00 : f32
    %7 = vector.broadcast %cst_5 : f32 to vector<10x256xf32>
    %8 = arith.maximumf %6, %7 : vector<10x256xf32>
    %c0_6 = arith.constant 0 : index
    %c0_7 = arith.constant 0 : index
    %9 = vector.load %arg4[%c0_6, %c0_7] : memref<10x10xbf16, #tpu.memory_space<vmem>>, vector<10x10xbf16>
    %10 = arith.truncf %8 : vector<10x256xf32> to vector<10x256xbf16>
    %cst_8 = arith.constant dense<0.000000e+00> : vector<10x256xf32>
    %11 = tpu.matmul %9, %10, %cst_8 {dimension_numbers = #tpu.dot_dimension_numbers<[1], [0], [0], [1], [0, 0, 1, 1], [], []>} : vector<10x10xbf16>, vector<10x256xbf16>, vector<10x256xf32> -> vector<10x256xf32>
    %c0_9 = arith.constant 0 : index
    %c0_10 = arith.constant 0 : index
    %12 = vector.load %arg5[%c0_9, %c0_10] : memref<10x1xf32, #tpu.memory_space<vmem>>, vector<10x1xf32>
    %13 = vector.broadcast %12 : vector<10x1xf32> to vector<10x256xf32>
    %14 = arith.addf %11, %13 : vector<10x256xf32>
    %cst_11 = arith.constant 0.000000e+00 : f32
    %15 = vector.broadcast %cst_11 : f32 to vector<10x256xf32>
    %16 = arith.maximumf %14, %15 : vector<10x256xf32>
    %c0_12 = arith.constant 0 : index
    %c0_13 = arith.constant 0 : index
    %17 = vector.load %arg6[%c0_12, %c0_13] : memref<2x10xbf16, #tpu.memory_space<vmem>>, vector<2x10xbf16>
    %18 = arith.truncf %16 : vector<10x256xf32> to vector<10x256xbf16>
    %cst_14 = arith.constant dense<0.000000e+00> : vector<2x256xf32>
    %19 = tpu.matmul %17, %18, %cst_14 {dimension_numbers = #tpu.dot_dimension_numbers<[1], [0], [0], [1], [0, 0, 1, 1], [], []>} : vector<2x10xbf16>, vector<10x256xbf16>, vector<2x256xf32> -> vector<2x256xf32>
    %c0_15 = arith.constant 0 : index
    %c0_16 = arith.constant 0 : index
    %20 = vector.load %arg7[%c0_15, %c0_16] : memref<2x1xf32, #tpu.memory_space<vmem>>, vector<2x1xf32>
    %21 = vector.broadcast %20 : vector<2x1xf32> to vector<2x256xf32>
    %22 = arith.addf %19, %21 : vector<2x256xf32>
    %c0_17 = arith.constant 0 : index
    %c0_18 = arith.constant 0 : index
    %23 = vector.load %arg8[%c0_17, %c0_18] : memref<2x256xf32, #tpu.memory_space<vmem>>, vector<2x256xf32>
    tpu.vector_store %arg8[%c0_17, %c0_18], %22 {strides = array<i32>} : memref<2x256xf32, #tpu.memory_space<vmem>>, vector<2x256xf32>,
    return
  }
  func.func @transform_0(%arg0: i32) -> (i32, i32) {
    %c0_i32 = arith.constant 0 : i32
    %c0_i32_0 = arith.constant 0 : i32
    return %arg0, %c0_i32 : i32, i32
  }
  func.func @transform_1(%arg0: i32) -> (i32, i32) {
    %c0_i32 = arith.constant 0 : i32
    %c0_i32_0 = arith.constant 0 : i32
    %c0_i32_1 = arith.constant 0 : i32
    return %c0_i32, %c0_i32_0 : i32, i32
  }
  func.func @transform_2(%arg0: i32) -> (i32, i32) {
    %c0_i32 = arith.constant 0 : i32
    %c0_i32_0 = arith.constant 0 : i32
    %c0_i32_1 = arith.constant 0 : i32
    return %c0_i32, %c0_i32_0 : i32, i32
  }
  func.func @transform_3(%arg0: i32) -> (i32, i32) {
    %c0_i32 = arith.constant 0 : i32
    %c0_i32_0 = arith.constant 0 : i32
    %c0_i32_1 = arith.constant 0 : i32
    return %c0_i32, %c0_i32_0 : i32, i32
  }
  func.func @transform_4(%arg0: i32) -> (i32, i32) {
    %c0_i32 = arith.constant 0 : i32
    %c0_i32_0 = arith.constant 0 : i32
    %c0_i32_1 = arith.constant 0 : i32
    return %c0_i32, %c0_i32_0 : i32, i32
  }
  func.func @transform_5(%arg0: i32) -> (i32, i32) {
    %c0_i32 = arith.constant 0 : i32
    %c0_i32_0 = arith.constant 0 : i32
    %c0_i32_1 = arith.constant 0 : i32
    return %c0_i32, %c0_i32_0 : i32, i32
  }
  func.func @transform_6(%arg0: i32) -> (i32, i32) {
    %c0_i32 = arith.constant 0 : i32
    %c0_i32_0 = arith.constant 0 : i32
    %c0_i32_1 = arith.constant 0 : i32
    return %c0_i32, %c0_i32_0 : i32, i32
  }
  func.func @transform_7(%arg0: i32) -> (i32, i32) {
    %c0_i32 = arith.constant 0 : i32
    %c0_i32_0 = arith.constant 0 : i32
    return %c0_i32, %arg0 : i32, i32
  }
}

</mosaic_0001>

<bundles_post_ra>
// kernel: my_module_forward.1
= control target key start
LH: loop header
LB: loop body
LE: loop exit
PB: predicated region body
PF: predicated region fallthrough
CT: control target
= control target key end

     0   :  { %s782_s24 = smov 0   ;;  %s893_s0 = inlined_call_operand.vmem [shape: f32[300,20], index: 0, kind: input, shape index: {}]   ;;  %s894_s1 = inlined_call_operand.vmem [shape: bf16[10,20], index: 1, kind: input, shape index: {}]   ;;  %s895_s2 = inlined_call_operand.vmem [shape: f32[10,1], index: 2, kind: input, shape index: {}]   ;;  %s896_s3 = inlined_call_operand.vmem [shape: bf16[10,10], index: 3, kind: input, shape index: {}]   ;;  %s897_s4 = inlined_call_operand.vmem [shape: f32[10,1], index: 4, kind: input, shape index: {}]   ;;  %s898_s5 = inlined_call_operand.vmem [shape: bf16[2,10], index: 5, kind: input, shape index: {}]   ;;  %s899_s6 = inlined_call_operand.vmem [shape: f32[2,1], index: 6, kind: input, shape index: {}]   ;;  %s900_s7 = inlined_call_operand.vmem [shape: f32[2,512], index: 7, kind: output, shape index: {}]  }
   0x1 LB: > { %s675_s25 = sadd.s32 4294967295, %s739_s24   ;;  %p679_p0 = scmp.ge.s32.totalorder %s739_s24, 1  ;;  %s739_s24 = sphi %s782_s24, %s17_s24  }
   0x2   : > { %p246_p1 = scmp.lt.s32.totalorder %s739_s24, 3 }
   0x4   : > { %p247_p2 = pnand %p679_p0, %p246_p1 }
   0x5   : > { %s680_s26 = sshll.u32 (!%p247_p2), %s675_s25, 5 }
   0x6   : > { %250 = sbr.rel (%p247_p2) target bundleno = 700 (0x2bc), region = 48  ;;  %p287_p3 = scmp.lt.s32.totalorder (!%p247_p2), %s680_s26, 37 }
   0xb   : > { %v795_v0 = vld [vmem:[%s894_s1] sm:$0x1f]   ;;  %vm370_vm0 = vcmask 162816   ;;  %v741_v2 = vmov 0   ;;  %s902_s26 = smov (!%p287_p3, %s680_s26), 37  ;;  %vm494_vm1 = vcmask 1044480  }
   0xc   : > { %v353_v1 = vld [vmem:[%s895_s2] sm:$0xff]  ;;  %729 = vset.pattern.permute.xlu0 %v741_v2  ;;  %533 = vmatprep.mubr.bf16.mxu1 %v741_v2  ;;  %v354_v3 = vld [vmem:[%s895_s2 + $0x8] sm:$0x3]  ;;  %s681_s10 = sshll.u32 %s902_s26, 3  ;;  %vm490_vm2 = vcmask 80896   ;;  %s682_s26 = sshll.u32 %s675_s25, 1 }
   0xd   : > { %710 = vmatprep.mubr.msk.bf16.mxu0 %vm370_vm0, %v795_v0  ;;  %357 = vperm.xlu0 %729, %v353_v1   ;;  %s811_s13 = scalar_lea.vmem %s893_s0, %s681_s10  ;;  %v551_v4 = vld [vmem:[%s899_s6] sm:$0x3]  ;;  %v474_v62 = vld [vmem:[%s897_s4 + $0x8] sm:$0x3]  ;;  %p297_p4 = scmp.lt.s32.totalorder %s682_s26, 3 }
   0xe   : > { %730 = vset.pattern.permute.xlu1 %v741_v2  ;;  %v333_v5 = vld [vmem:[%s811_s13 + $0xf0] sm:$0xff]  ;;  %v334_v6 = vld [vmem:[%s811_s13 + $0xf8] sm:$0xff]  ;;  %v331_v10 = vld [vmem:[%s811_s13 + $0xe0] sm:$0xff] }
   0xf   : > { %v317_v7 = vld [vmem:[%s811_s13 + $0x70] sm:$0xff]  ;;  %v350_v8 = vpack.c.bf16 %v334_v6, %v333_v5  ;;  %v318_v9 = vld [vmem:[%s811_s13 + $0x78] sm:$0xff]  ;;  %v332_v11 = vld [vmem:[%s811_s13 + $0xe8] sm:$0xff]  ;;  %s904_s26 = smov (!%p297_p4, %s682_s26), 3 }
  0x10   : > { %v342_v12 = vpack.c.bf16 %v318_v9, %v317_v7  ;;  %v349_v13 = vpack.c.bf16 %v332_v11, %v331_v10  ;;  %v315_v14 = vld [vmem:[%s811_s13 + $0x60] sm:$0xff]  ;;  %v316_v15 = vld [vmem:[%s811_s13 + $0x68] sm:$0xff]  ;;  %v329_v18 = vld [vmem:[%s811_s13 + $0xd0] sm:$0xff]  ;;  %s683_s27 = sshll.u32 %s904_s26, 1 }
  0x11   : > { %362 = vperm.xlu0 %729, %v354_v3   ;;  %712 = vmatprep.subr.msk.bf16.mxu0 %vm370_vm0, %v350_v8  ;;  %v341_v17 = vpack.c.bf16 %v316_v15, %v315_v14  ;;  %v330_v19 = vld [vmem:[%s811_s13 + $0xd8] sm:$0xff]  ;;  %v313_v22 = vld [vmem:[%s811_s13 + $0x50] sm:$0xff]  ;;  %v327_v25 = vld [vmem:[%s811_s13 + $0xc0] sm:$0xff]  ;;  %s300_s30 = scalar_lea.vmem %s900_s7, %s683_s27 }
  0x12   : > { %v396_v16 = vsel %vm370_vm0, %v342_v12, 0  ;;  %v348_v21 = vpack.c.bf16 %v330_v19, %v329_v18  ;;  %v314_v23 = vld [vmem:[%s811_s13 + $0x58] sm:$0xff]  ;;  %v328_v26 = vld [vmem:[%s811_s13 + $0xc8] sm:$0xff]  ;;  %v311_v29 = vld [vmem:[%s811_s13 + $0x40] sm:$0xff] }
  0x13   : > { %695 = vmatpush3.bf16.xpose.msra.mxu0 %v396_v16  ;;  %v393_v20 = vsel %vm370_vm0, %v341_v17, 0  ;;  %v340_v24 = vpack.c.bf16 %v314_v23, %v313_v22  ;;  %v347_v28 = vpack.c.bf16 %v328_v26, %v327_v25  ;;  %v312_v30 = vld [vmem:[%s811_s13 + $0x48] sm:$0xff]  ;;  %v325_v32 = vld [vmem:[%s811_s13 + $0xb0] sm:$0xff]  ;;  %v326_v33 = vld [vmem:[%s811_s13 + $0xb8] sm:$0xff] }
  0x14   : > { %713 = vmatprep.subr.msk.bf16.mxu0 %vm370_vm0, %v349_v13  ;;  %v339_v31 = vpack.c.bf16 %v312_v30, %v311_v29  ;;  %v346_v35 = vpack.c.bf16 %v326_v33, %v325_v32  ;;  %v309_v36 = vld [vmem:[%s811_s13 + $0x30] sm:$0xff]  ;;  %v310_v37 = vld [vmem:[%s811_s13 + $0x38] sm:$0xff]  ;;  %v323_v39 = vld [vmem:[%s811_s13 + $0xa0] sm:$0xff] }
  0x15   : > { %554 = vperm.xlu0 %729, %v551_v4   ;;  %v390_v27 = vsel %vm370_vm0, %v340_v24, 0  ;;  %v338_v38 = vpack.c.bf16 %v310_v37, %v309_v36  ;;  %v324_v40 = vld [vmem:[%s811_s13 + $0xa8] sm:$0xff]  ;;  %v307_v43 = vld [vmem:[%s811_s13 + $0x20] sm:$0xff]  ;;  %v321_v46 = vld [vmem:[%s811_s13 + $0x90] sm:$0xff] }
  0x16   : > { %v387_v34 = vsel %vm370_vm0, %v339_v31, 0  ;;  %v345_v42 = vpack.c.bf16 %v324_v40, %v323_v39  ;;  %v308_v44 = vld [vmem:[%s811_s13 + $0x28] sm:$0xff]  ;;  %v322_v47 = vld [vmem:[%s811_s13 + $0x98] sm:$0xff]  ;;  %v305_v50 = vld [vmem:[%s811_s13 + $0x10] sm:$0xff] }
  0x17   : > { %v384_v41 = vsel %vm370_vm0, %v338_v38, 0  ;;  %v337_v45 = vpack.c.bf16 %v308_v44, %v307_v43  ;;  %v344_v49 = vpack.c.bf16 %v322_v47, %v321_v46  ;;  %v306_v51 = vld [vmem:[%s811_s13 + $0x18] sm:$0xff]  ;;  %v319_v53 = vld [vmem:[%s811_s13 + $0x80] sm:$0xff]  ;;  %v320_v54 = vld [vmem:[%s811_s13 + $0x88] sm:$0xff] }
  0x18   : > { %v336_v52 = vpack.c.bf16 %v306_v51, %v305_v50  ;;  %v343_v56 = vpack.c.bf16 %v320_v54, %v319_v53  ;;  %v303_v57 = vld [vmem:[%s811_s13] sm:$0xff]  ;;  %v304_v58 = vld [vmem:[%s811_s13 + $0x8] sm:$0xff] }
  0x19   : > { %v381_v48 = vsel %vm370_vm0, %v337_v45, 0  ;;  %v335_v59 = vpack.c.bf16 %v304_v58, %v303_v57  ;;  %v473_v61 = vld [vmem:[%s897_s4] sm:$0xff] }
  0x1a   : > { %v378_v55 = vsel %vm370_vm0, %v336_v52, 0  ;;  %477 = vperm.xlu1 %730, %v473_v61   ;;  %v732_v17 = vld [vmem:[%s896_s3] sm:$0x1f]  }
  0x1b   : > { %697 = vmatpush3.bf16.xpose.msra.mxu0 %v393_v20  ;;  %v375_v60 = vsel %vm370_vm0, %v335_v59, 0 }
  0x1c   : > { %714 = vmatprep.subr.msk.bf16.mxu0 %vm370_vm0, %v348_v21 }
  0x1e   : > { %482 = vperm.xlu1 %730, %v474_v62  }
  0x23   : > { %699 = vmatpush3.bf16.xpose.msra.mxu0 %v390_v27 }
  0x24   : > { %715 = vmatprep.subr.msk.bf16.mxu0 %vm370_vm0, %v347_v28 }
  0x2b   : > { %701 = vmatpush3.bf16.xpose.msra.mxu0 %v387_v34  ;;  %v548_v34 = vld [vmem:[%s898_s5] sm:$0x1] }
  0x2c   : > { %716 = vmatprep.subr.msk.bf16.mxu0 %vm370_vm0, %v346_v35 }
  0x33   : > { %703 = vmatpush3.bf16.xpose.msra.mxu0 %v384_v41 }
  0x34   : > { %717 = vmatprep.subr.msk.bf16.mxu0 %vm370_vm0, %v345_v42 }
  0x3b   : > { %705 = vmatpush3.bf16.xpose.msra.mxu0 %v381_v48 }
  0x3c   : > { %718 = vmatprep.subr.msk.bf16.mxu0 %vm370_vm0, %v344_v49 }
  0x43   : > { %707 = vmatpush3.bf16.xpose.msra.mxu0 %v378_v55 }
  0x44   : > { %719 = vmatprep.subr.msk.bf16.mxu0 %vm370_vm0, %v343_v56 }
  0x4b   : > { %709 = vmatpush3.bf16.xpose.msra.mxu0 %v375_v60 }
  0x52   : > { %711 = vmatmul.mubr.msk.bf16.vlgmr.msra.gmra.mxu0 %vm370_vm0, %v795_v0 }
  0x88   : > { %v358_v63 = vpop.permute.xlu0 %357 }
  0x8c   : > { %v363_v5 = vpop.permute.xlu0 %362 }
  0x90   : > { %v555_v36 = vpop.permute.xlu0 %554 }
  0x95   : > { %v478_v18 = vpop.permute.xlu1 %477 }
  0x99   : > { %v483_v22 = vpop.permute.xlu1 %482 }
 0x112   : > { %v456_v1 = vpop.f32.mrf.mxu0 }
 0x113   : > { %v457_v4 = vadd.f32 %v456_v1, %v358_v63 }
 0x114   : > { %v458_v3 = vpop.f32.mrf.mxu0 }
 0x115   : > { %v459_v7 = vadd.f32 %v458_v3, %v358_v63  ;;  %v465_v0 = vmax.f32 %v457_v4, 0.0 }
 0x116   : > { %v460_v6 = vpop.f32.mrf.mxu0 }
 0x117   : > { %v461_v8 = vadd.f32 %v460_v6, %v363_v5  ;;  %v466_v12 = vmax.f32 %v459_v7, 0.0 }
 0x118   : > { %v462_v9 = vpop.f32.mrf.mxu0 }
 0x119   : > { %v467_v10 = vmax.f32 %v461_v8, 0.0  ;;  %v463_v11 = vadd.f32 %v462_v9, %v363_v5 }
 0x11b   : > { %v468_v13 = vmax.f32 %v463_v11, 0.0  ;;  %v471_v14 = vpack.c.bf16 %v467_v10, %v465_v0 }
 0x11d   : > { %v472_v15 = vpack.c.bf16 %v468_v13, %v466_v12  ;;  %v496_v16 = vsel %vm494_vm1, %v471_v14, 0 }
 0x11f   : > { %687 = vmatprep.subr.msk.bf16.mxu1 %vm494_vm1, %v472_v15 }
 0x120   : > { %516 = vmatpush1.bf16.msra.mxu1 %v496_v16 }
 0x123   : > { %688 = vmatmul.mubr.msk.bf16.vlgmr.msra.gmra.mxu1 %vm490_vm2, %v732_v17 }
 0x124   : > { %598 = vmatprep.mubr.bf16.mxu1 %v741_v2 }
 0x1e3   : > { %v535_v19 = vpop.f32.mrf.mxu1 }
 0x1e4   : > { %v536_v21 = vadd.f32 %v535_v19, %v478_v18 }
 0x1e5   : > { %v537_v20 = vpop.f32.mrf.mxu1 }
 0x1e6   : > { %v538_v24 = vadd.f32 %v537_v20, %v478_v18  ;;  %v544_v27 = vmax.f32 %v536_v21, 0.0 }
 0x1e7   : > { %v539_v23 = vpop.f32.mrf.mxu1 }
 0x1e8   : > { %v540_v25 = vadd.f32 %v539_v23, %v483_v22  ;;  %v545_v30 = vmax.f32 %v538_v24, 0.0 }
 0x1e9   : > { %v541_v26 = vpop.f32.mrf.mxu1 }
 0x1ea   : > { %v546_v28 = vmax.f32 %v540_v25, 0.0  ;;  %v542_v29 = vadd.f32 %v541_v26, %v483_v22 }
 0x1ec   : > { %v549_v31 = vpack.c.bf16 %v546_v28, %v544_v27  ;;  %v547_v32 = vmax.f32 %v542_v29, 0.0 }
 0x1ee   : > { %v550_v33 = vpack.c.bf16 %v547_v32, %v545_v30  ;;  %v561_v2 = vsel %vm494_vm1, %v549_v31, 0 }
 0x1f0   : > { %689 = vmatprep.subr.msk.bf16.mxu1 %vm494_vm1, %v550_v33 }
 0x1f1   : > { %581 = vmatpush1.bf16.msra.mxu1 %v561_v2 }
 0x1f4   : > { %690 = vmatmul.mubr.msk.bf16.vlgmr.msra.gmra.mxu1 %vm490_vm2, %v548_v34 }
 0x2b4   : > { %v600_v35 = vpop.f32.mrf.mxu1 }
 0x2b5   : > { %v601_v38 = vadd.f32 %v600_v35, %v555_v36 }
 0x2b6   : > { %v602_v37 = vpop.f32.mrf.mxu1 }
 0x2b7   : > { %v603_v39 = vadd.f32 %v602_v37, %v555_v36 }
 0x2b8   : > { %v604_v40 = vpop.f32.mrf.mxu1 }
 0x2b9   : > { %v609_v41 = vcombine.low %v601_v38, %v603_v39 }
 0x2ba   : > { %v605_v42 = vpop.f32.mrf.mxu1 }
 0x2bb   : > { %691 = vst.sshfl [vmem:[%s300_s30] sm:$0x33 pattern:$0x76325410] %v609_v41 }
 0x2bc PF: > { %s17_s24 = sadd.s32 1, %s739_s24  }
 0x2bd   : > { %p14_p5 = scmp.ge.s32.totalorder %s17_s24, 4  }
 0x2bf   :  { %16 = sbr.rel (!%p14_p5) target bundleno = 1 (0x1), region = 78 }

</bundles_post_ra>
